<compile_context>
chip_gen: v7x
topology: tpu7x:2x2x1
jax: 0.10.0
libtpu: 0.0.40
codegen_flags: <defaults>
</compile_context>

<pallas_src>
import jax
import jax.numpy as jnp
from jax.experimental import pallas as pl
from jax.experimental.pallas import tpu as pltpu


TB_MAX = 8192                    # max lane-axis tile (multiple of 128)
_ONEHOT_VMEM_BUDGET = 6 << 20    # budget for one-hot intermediates + resident tables


def _cdiv(a, b):
    return -(-a // b)


def _round_up(x, m):
    return _cdiv(x, m) * m


def _choose_tb(batch, tb_max=TB_MAX):
    """Largest tile that still gives >=2 grid steps (when possible) for v7x megacore."""
    b128 = _round_up(max(int(batch), 1), 128)
    if b128 <= 128:
        return 128
    half = _round_up(_cdiv(b128, 2), 128)
    return int(min(tb_max, half))


def mf_onehot_kernel(wt_ref, ht_ref, u_ref, i_ref, out_ref):
    # wt_ref: (K, NU), ht_ref: (K, NI)  -- full tables, VMEM-resident (constant block idx)
    # u_ref, i_ref: (1, TB) int32 index blocks; out_ref: (1, TB) lane-dense output.
    uidx = u_ref[...]                                    # (1, TB)
    iidx = i_ref[...]                                    # (1, TB)
    nu = wt_ref.shape[1]
    ni = ht_ref.shape[1]
    tb = uidx.shape[1]
    u_oh = (jax.lax.broadcasted_iota(jnp.int32, (nu, tb), 0) == uidx).astype(jnp.float32)
    i_oh = (jax.lax.broadcasted_iota(jnp.int32, (ni, tb), 0) == iidx).astype(jnp.float32)
    u = jnp.dot(wt_ref[...], u_oh, preferred_element_type=jnp.float32)   # (K, TB) MXU gather
    v = jnp.dot(ht_ref[...], i_oh, preferred_element_type=jnp.float32)   # (K, TB) MXU gather
    s = jnp.sum(u * v, axis=0, keepdims=True)            # VPU mul + sublane reduce (XLU)
    out_ref[...] = jax.nn.sigmoid(s)                     # EUP sigmoid


def mf_dot_kernel(u_ref, v_ref, out_ref):
    # u_ref, v_ref: (K, TB) gathered slabs (batch on lanes); out_ref: (1, TB).
    s = jnp.sum(u_ref[...] * v_ref[...], axis=0, keepdims=True)
    out_ref[...] = jax.nn.sigmoid(s)


def mf_forward(W, H, user_idx, item_idx, *, tb_max=TB_MAX, gather_in_kernel=None):
    """Pallas implementation of MF.forward. Returns shape (B,) float32."""
    B = int(user_idx.shape[0])
    NU, K = W.shape
    NI = H.shape[0]

    tb = _choose_tb(B, tb_max)
    padded_b = _round_up(B, tb)
    n_tiles = padded_b // tb
    pad = padded_b - B

    uidx = jnp.pad(user_idx.astype(jnp.int32), (0, pad))
    iidx = jnp.pad(item_idx.astype(jnp.int32), (0, pad))

    # Transpose the *tiny* parameter tables (O(num_entities*K) bytes),
    # never the (padded_b, K) gathered activation slabs.
    WT = W.T.astype(jnp.float32)   # (K, NU)
    HT = H.T.astype(jnp.float32)   # (K, NI)

    if gather_in_kernel is None:
        onehot_bytes = (NU + NI) * tb * 4
        table_bytes = _round_up(K, 8) * (NU + NI) * 4
        gather_in_kernel = (onehot_bytes + table_bytes) <= _ONEHOT_VMEM_BUDGET

    if gather_in_kernel:
        cost = pl.CostEstimate(
            flops=int(2 * (NU + NI) * K * padded_b + 3 * K * padded_b),
            transcendentals=int(padded_b),
            bytes_accessed=int((NU + NI) * K * 4 + 3 * padded_b * 4),
        )
        out = pl.pallas_call(
            mf_onehot_kernel,
            out_shape=jax.ShapeDtypeStruct((1, padded_b), jnp.float32),
            grid_spec=pl.GridSpec(
                grid=(n_tiles,),
                in_specs=[
                    pl.BlockSpec((K, NU), lambda i: (0, 0)),   # full table, VMEM-resident
                    pl.BlockSpec((K, NI), lambda i: (0, 0)),   # full table, VMEM-resident
                    pl.BlockSpec((1, tb), lambda i: (0, i)),   # user index block
                    pl.BlockSpec((1, tb), lambda i: (0, i)),   # item index block
                ],
                out_specs=pl.BlockSpec((1, tb), lambda i: (0, i)),
            ),
            compiler_params=pltpu.CompilerParams(
                dimension_semantics=("parallel",)),
            cost_estimate=cost,
        )(WT, HT, uidx.reshape(1, padded_b), iidx.reshape(1, padded_b))
    else:
        # Large tables: wrapper-side gather straight from pre-transposed tables
        # -> (K, padded_b) slabs in the right layout, no extra slab transpose.
        U = jnp.take(WT, uidx, axis=1)   # (K, padded_b)
        V = jnp.take(HT, iidx, axis=1)   # (K, padded_b)
        cost = pl.CostEstimate(
            flops=int(3 * K * padded_b),
            transcendentals=int(padded_b),
            bytes_accessed=int(2 * K * padded_b * 4 + padded_b * 4),
        )
        out = pl.pallas_call(
            mf_dot_kernel,
            out_shape=jax.ShapeDtypeStruct((1, padded_b), jnp.float32),
            grid_spec=pl.GridSpec(
                grid=(n_tiles,),
                in_specs=[
                    pl.BlockSpec((K, tb), lambda i: (0, i)),
                    pl.BlockSpec((K, tb), lambda i: (0, i)),
                ],
                out_specs=pl.BlockSpec((1, tb), lambda i: (0, i)),
            ),
            compiler_params=pltpu.CompilerParams(
                dimension_semantics=("parallel",)),
            cost_estimate=cost,
        )(U, V)

    return out.reshape(padded_b)[:B]


def mf_forward_ref(W, H, user_idx, item_idx):
    """Pure-JAX reference for correctness check."""
    u = W[user_idx]
    v = H[item_idx]
    return jax.nn.sigmoid(jnp.sum(u * v, axis=1))


if __name__ == "__main__":
    # Small shapes consistent with MF.__init__ defaults.
    nums_user = 32
    nums_item = 64
    embedding_k = 10
    batch = 8

    key = jax.random.PRNGKey(0)
    k_w, k_h, k_u, k_i = jax.random.split(key, 4)

    # nn.Embedding default init: N(0, 1).
    W = jax.random.normal(k_w, (nums_user, embedding_k), dtype=jnp.float32)
    H = jax.random.normal(k_h, (nums_item, embedding_k), dtype=jnp.float32)

    user_idx = jax.random.randint(k_u, (batch,), 0, nums_user, dtype=jnp.int32)
    item_idx = jax.random.randint(k_i, (batch,), 0, nums_item, dtype=jnp.int32)

    ref = mf_forward_ref(W, H, user_idx, item_idx)

    # Primary path: in-kernel one-hot gather with VMEM-resident tables.
    out = jax.block_until_ready(mf_forward(W, H, user_idx, item_idx))
    assert out.shape == (batch,)
    assert jnp.allclose(out, ref, atol=1e-5, rtol=1e-5), (out, ref)

    # Fallback path: wrapper-side gather from pre-transposed tables.
    out_fb = jax.block_until_ready(
        mf_forward(W, H, user_idx, item_idx, gather_in_kernel=False))
    assert out_fb.shape == (batch,)
    assert jnp.allclose(out_fb, ref, atol=1e-5, rtol=1e-5), (out_fb, ref)

    print("KERNEL_OK")
</pallas_src>

<mosaic_0001>
module attributes {stable_mosaic.version = 11 : i64} {
  func.func @mf_onehot_kernel(%arg0: i32, %arg1: memref<10x32xf32, #tpu.memory_space<vmem>>, %arg2: memref<10x64xf32, #tpu.memory_space<vmem>>, %arg3: memref<1x128xi32, #tpu.memory_space<vmem>>, %arg4: memref<1x128xi32, #tpu.memory_space<vmem>>, %arg5: memref<1x128xf32, #tpu.memory_space<vmem>>) attributes {dimension_semantics = [#tpu.dimension_semantics<parallel>], iteration_bounds = array<i64: 1>, scalar_prefetch = 0 : i64, scratch_operands = 0 : i64, tpu.core_type = #tpu.core_type<tc>, window_params = [{pipeline_mode = #tpu.pipeline_mode<synchronous>, transform_indices = @transform_0, window_bounds = array<i64: 10, 32>}, {pipeline_mode = #tpu.pipeline_mode<synchronous>, transform_indices = @transform_1, window_bounds = array<i64: 10, 64>}, {transform_indices = @transform_2, window_bounds = array<i64: 1, 128>}, {transform_indices = @transform_3, window_bounds = array<i64: 1, 128>}, {transform_indices = @transform_4, window_bounds = array<i64: 1, 128>}]} {
    %c0 = arith.constant 0 : index
    %c0_0 = arith.constant 0 : index
    %0 = vector.load %arg3[%c0, %c0_0] : memref<1x128xi32, #tpu.memory_space<vmem>>, vector<1x128xi32>
    %c0_1 = arith.constant 0 : index
    %c0_2 = arith.constant 0 : index
    %1 = vector.load %arg4[%c0_1, %c0_2] : memref<1x128xi32, #tpu.memory_space<vmem>>, vector<1x128xi32>
    %2 = tpu.iota {dimensions = array<i32: 0>} : vector<32x128xi32>
    %3 = vector.broadcast %0 : vector<1x128xi32> to vector<32x128xi32>
    %4 = arith.cmpi eq, %2, %3 : vector<32x128xi32>
    %5 = arith.extui %4 : vector<32x128xi1> to vector<32x128xi32>
    %6 = arith.sitofp %5 : vector<32x128xi32> to vector<32x128xf32>
    %7 = tpu.iota {dimensions = array<i32: 0>} : vector<64x128xi32>
    %8 = vector.broadcast %1 : vector<1x128xi32> to vector<64x128xi32>
    %9 = arith.cmpi eq, %7, %8 : vector<64x128xi32>
    %10 = arith.extui %9 : vector<64x128xi1> to vector<64x128xi32>
    %11 = arith.sitofp %10 : vector<64x128xi32> to vector<64x128xf32>
    %c0_3 = arith.constant 0 : index
    %c0_4 = arith.constant 0 : index
    %12 = vector.load %arg1[%c0_3, %c0_4] : memref<10x32xf32, #tpu.memory_space<vmem>>, vector<10x32xf32>
    %cst = arith.constant dense<0.000000e+00> : vector<10x128xf32>
    %13 = tpu.matmul %12, %6, %cst {dimension_numbers = #tpu.dot_dimension_numbers<[1], [0], [0], [1], [0, 0, 1, 1], [], []>} : vector<10x32xf32>, vector<32x128xf32>, vector<10x128xf32> -> vector<10x128xf32>
    %c0_5 = arith.constant 0 : index
    %c0_6 = arith.constant 0 : index
    %14 = vector.load %arg2[%c0_5, %c0_6] : memref<10x64xf32, #tpu.memory_space<vmem>>, vector<10x64xf32>
    %cst_7 = arith.constant dense<0.000000e+00> : vector<10x128xf32>
    %15 = tpu.matmul %14, %11, %cst_7 {dimension_numbers = #tpu.dot_dimension_numbers<[1], [0], [0], [1], [0, 0, 1, 1], [], []>} : vector<10x64xf32>, vector<64x128xf32>, vector<10x128xf32> -> vector<10x128xf32>
    %16 = arith.mulf %13, %15 : vector<10x128xf32>
    %cst_8 = arith.constant dense<0.000000e+00> : vector<128xf32>
    %17 = vector.multi_reduction <add>, %16, %cst_8 [0] : vector<10x128xf32> to vector<128xf32>
    %18 = vector.shape_cast %17 : vector<128xf32> to vector<1x128xf32>
    %19 = arith.negf %18 : vector<1x128xf32>
    %20 = math.exp %19 : vector<1x128xf32>
    %cst_9 = arith.constant 1.000000e+00 : f32
    %21 = vector.broadcast %cst_9 : f32 to vector<1x128xf32>
    %22 = arith.addf %21, %20 : vector<1x128xf32>
    %23 = arith.divf %21, %22 : vector<1x128xf32>
    %c0_10 = arith.constant 0 : index
    %c0_11 = arith.constant 0 : index
    %24 = vector.load %arg5[%c0_10, %c0_11] : memref<1x128xf32, #tpu.memory_space<vmem>>, vector<1x128xf32>
    tpu.vector_store %arg5[%c0_10, %c0_11], %23 {strides = array<i32>} : memref<1x128xf32, #tpu.memory_space<vmem>>, vector<1x128xf32>,
    return
  }
  func.func @transform_0(%arg0: i32) -> (i32, i32) {
    %c0_i32 = arith.constant 0 : i32
    %c0_i32_0 = arith.constant 0 : i32
    %c0_i32_1 = arith.constant 0 : i32
    return %c0_i32, %c0_i32_0 : i32, i32
  }
  func.func @transform_1(%arg0: i32) -> (i32, i32) {
    %c0_i32 = arith.constant 0 : i32
    %c0_i32_0 = arith.constant 0 : i32
    %c0_i32_1 = arith.constant 0 : i32
    return %c0_i32, %c0_i32_0 : i32, i32
  }
  func.func @transform_2(%arg0: i32) -> (i32, i32) {
    %c0_i32 = arith.constant 0 : i32
    %c0_i32_0 = arith.constant 0 : i32
    return %c0_i32, %arg0 : i32, i32
  }
  func.func @transform_3(%arg0: i32) -> (i32, i32) {
    %c0_i32 = arith.constant 0 : i32
    %c0_i32_0 = arith.constant 0 : i32
    return %c0_i32, %arg0 : i32, i32
  }
  func.func @transform_4(%arg0: i32) -> (i32, i32) {
    %c0_i32 = arith.constant 0 : i32
    %c0_i32_0 = arith.constant 0 : i32
    return %c0_i32, %arg0 : i32, i32
  }
}

</mosaic_0001>

<bundles_post_ra>
// kernel: tpu_custom_call.1
= control target key start
LH: loop header
LB: loop body
LE: loop exit
PB: predicated region body
PF: predicated region fallthrough
CT: control target
= control target key end

     0   :  { %9 = vsyncpa [#allocation3], 0  ;;  %s563_s0 = inlined_call_operand.hbm [shape: f32[10,32], index: 0, kind: input, shape index: {}]   ;;  %s564_s1 = inlined_call_operand.hbm [shape: f32[10,64], index: 1, kind: input, shape index: {}]   ;;  %s565_s2 = inlined_call_operand.vmem [shape: s32[1,128], index: 2, kind: input, shape index: {}]   ;;  %s566_s3 = inlined_call_operand.vmem [shape: s32[1,128], index: 3, kind: input, shape index: {}]   ;;  %s567_s4 = inlined_call_operand.hbm [shape: f32[1,128], index: 4, kind: output, shape index: {}]  }
   0x1   :  { %10 = vsyncpa [#allocation6], 0 }
   0x2   :  { %11 = vsyncpa [#allocation4], 0  ;;  %s486_s15 = smov [#allocation2]   ;;  %s414_s19 = scalar_lea.hbm %s563_s0, 256 }
   0x3   :  { %s17_s16 = sshll.u32 %s486_s15, 4  ;;  %p415_p0 = scmp.ne.s32.totalorder %s563_s0, %s414_s19  ;;  %s18_s16 = int_to_ptr.vmem [resolvable:$true] %s17_s16 }
   0x4   :  { %p418_p1 = scmp.lt.u32.totalorder %s414_s19, %s563_s0 }
   0x6   :  { %p420_p2 = pnand %p418_p1, %p415_p0 }
   0x8   :  { %423 = shalt.err (!%p420_p2)
}
   0x9   :  { %s424_s24 = scalar_lea.vmem %s18_s16, 256  ;;  %p429_p4 = scmp.lt.s32.totalorder %s18_s16, %s18_s16 }
   0xa   :  { %p425_p3 = scmp.ne.s32.totalorder %s18_s16, %s424_s24  ;;  %p430_p5 = scmp.lt.s32.totalorder %s424_s24, %s424_s24 }
   0xc   :  { %p431_p6 = por %p430_p5, %p429_p4 }
   0xe   :  { %p432_p7 = pnand %p431_p6, %p425_p3 }
  0x10   :  { %435 = shalt.err (!%p432_p7)
}
  0x11   :  { %s487_s25 = smov 128   ;;  %s488_s26 = smov 8  }
  0x12   :  { %23 = dma.hbm_to_vmem [thread:$0]  %s563_s0, 256, %s18_s16, [#allocation3], %s487_s25, %s487_s25, %s488_s26  }
  0x13   :  { %s489_s29 = smov [#allocation5]   ;;  %s436_s7 = scalar_lea.hbm %s564_s1, 256 }
  0x14   :  { %s29_s30 = sshll.u32 %s489_s29, 4  ;;  %p437_p8 = scmp.ne.s32.totalorder %s564_s1, %s436_s7  ;;  %s30_s30 = int_to_ptr.vmem [resolvable:$true] %s29_s30 }
  0x15   :  { %p440_p9 = scmp.lt.u32.totalorder %s436_s7, %s564_s1 }
  0x17   :  { %p442_p10 = pnand %p440_p9, %p437_p8 }
  0x19   :  { %445 = shalt.err (!%p442_p10)
}
  0x1a   :  { %s446_s12 = scalar_lea.vmem %s30_s30, 256  ;;  %p451_p12 = scmp.lt.s32.totalorder %s30_s30, %s30_s30 }
  0x1b   :  { %p447_p11 = scmp.ne.s32.totalorder %s30_s30, %s446_s12  ;;  %p452_p13 = scmp.lt.s32.totalorder %s446_s12, %s446_s12 }
  0x1d   :  { %p453_p0 = por %p452_p13, %p451_p12 }
  0x1f   :  { %p454_p1 = pnand %p453_p0, %p447_p11 }
  0x21   :  { %457 = shalt.err (!%p454_p1)
}
  0x22   :  { %35 = dma.hbm_to_vmem [thread:$0]  %s564_s1, 256, %s30_s30, [#allocation6], %s487_s25, %s487_s25, %s488_s26  }
  0x23   :  { %480 = dma.done.wait [#allocation3], 256  }
  0x24   :  { %481 = vsyncadd [#allocation3], 4294967040 }
  0x25   :  { %482 = dma.done.wait [#allocation6], 256  }
  0x26   :  { %483 = vsyncadd [#allocation6], 4294967040  ;;  %v48_v0 = vlaneseq  ;;  %vm568_vm0 = vcmask 261120   ;;  %vm569_vm1 = vcmask 523264   ;;  %v308_v7 = vld [vmem:[%s566_s3] ss:$0 sm:$0xff] }
  0x27   :  { %v303_v8 = vld [vmem:[%s565_s2] ss:$0 sm:$0xff]  ;;  %v185_v10 = vld [vmem:[#allocation5] sm:$0xff]  ;;  %v490_v11 = vmov 1.0|1.0   ;;  %s491_s1 = smov [#allocation7]  }
  0x28   :  { %v49_v1 = vshrl.u32 %v48_v0, 7  ;;  %v101_v9 = vld [vmem:[#allocation2] sm:$0xff]  ;;  %377 = vmatprep.mubr.msk.f32.mxu1 %vm569_vm1, %v185_v10  ;;  %v102_v14 = vld [vmem:[#allocation2 + $0x8] sm:$0x3]  ;;  %v186_v15 = vld [vmem:[#allocation5 + $0x8] sm:$0x3] }
  0x29   :  { %358 = vmatprep.mubr.msk.f32.mxu0 %vm568_vm0, %v101_v9  ;;  %s293_s2 = sshll.u32 %s491_s1, 4  ;;  %s294_s2 = int_to_ptr.vmem [resolvable:$true] %s293_s2 }
  0x2a   :  { %v50_v2 = vadd.s32 8, %v49_v1  ;;  %v51_v3 = vadd.s32 16, %v49_v1  ;;  %v52_v4 = vadd.s32 24, %v49_v1  ;;  %v69_v5 = vadd.s32 32, %v49_v1  ;;  %s458_s3 = scalar_lea.vmem %s294_s2, 16  ;;  %s462_s18 = scalar_lea.vmem %s294_s2, 32 }
  0x2b   :  { %v70_v6 = vadd.s32 40, %v49_v1  ;;  %vm77_vm2 = vcmp.eq.s32.totalorder %v49_v1, %v308_v7  ;;  %vm57_vm7 = vcmp.eq.s32.totalorder %v49_v1, %v303_v8  ;;  %v71_v12 = vadd.s32 48, %v49_v1  ;;  %p459_p2 = scmp.ne.s32.totalorder %s294_s2, %s458_s3  ;;  %p463_p3 = scmp.lt.s32.totalorder %s294_s2, %s294_s2 }
  0x2c   :  { %vm78_vm3 = vcmp.eq.s32.totalorder %v50_v2, %v308_v7  ;;  %vm79_vm4 = vcmp.eq.s32.totalorder %v51_v3, %v308_v7  ;;  %vm80_vm5 = vcmp.eq.s32.totalorder %v52_v4, %v308_v7  ;;  %vm58_vm8 = vcmp.eq.s32.totalorder %v50_v2, %v303_v8  ;;  %p464_p4 = scmp.lt.s32.totalorder %s462_s18, %s458_s3 }
  0x2d   :  { %vm388_vm6 = vmpackc.low %vm78_vm3, %vm77_vm2  ;;  %vm81_vm9 = vcmp.eq.s32.totalorder %v69_v5, %v308_v7  ;;  %vm82_vm10 = vcmp.eq.s32.totalorder %v70_v6, %v308_v7  ;;  %vm59_vm12 = vcmp.eq.s32.totalorder %v51_v3, %v303_v8  ;;  %vm60_vm13 = vcmp.eq.s32.totalorder %v52_v4, %v303_v8 }
  0x2e   :  { %389 = vmatprep.subr.msk.bf16.mxu1 %vm388_vm6, %v490_v11  ;;  %vm392_vm11 = vmpackc.low %vm80_vm5, %vm79_vm4  ;;  %v72_v13 = vadd.s32 56, %v49_v1  ;;  %vm83_vm3 = vcmp.eq.s32.totalorder %v71_v12, %v308_v7  ;;  %vm570_vm4 = vcmask 261120   ;;  %vm571_vm5 = vcmask 523264   ;;  %p465_p5 = por %p464_p4, %p463_p3 }
  0x2f   :  { %391 = vmatpush3.bf16.msk.msra.mxu1 %vm388_vm6, %v490_v11  ;;  %vm380_vm14 = vmpackc.low %vm58_vm8, %vm57_vm7  ;;  %vm271_vm6 = vcmask 1041408  }
  0x30   :  { %393 = vmatprep.subr.msk.bf16.mxu1 %vm392_vm11, %v490_v11  ;;  %381 = vmatprep.subr.msk.bf16.mxu0 %vm380_vm14, %v490_v11  ;;  %vm396_vm15 = vmpackc.low %vm82_vm10, %vm81_vm9  ;;  %vm84_vm0 = vcmp.eq.s32.totalorder %v72_v13, %v308_v7  ;;  %p466_p6 = pnand %p465_p5, %p459_p2 }
  0x31   :  { %383 = vmatpush3.bf16.msk.msra.mxu0 %vm380_vm14, %v490_v11  ;;  %vm384_vm2 = vmpackc.low %vm60_vm13, %vm59_vm12 }
  0x32   :  { %385 = vmatprep.subr.msk.bf16.mxu0 %vm384_vm2, %v490_v11  ;;  %vm400_vm1 = vmpackc.low %vm84_vm0, %vm83_vm3 }
  0x33   :  { %395 = vmatpush3.bf16.msk.msra.mxu1 %vm392_vm11, %v490_v11 }
  0x34   :  { %397 = vmatprep.subr.msk.bf16.mxu1 %vm396_vm15, %v490_v11 }
  0x35   :  { %387 = vmatpush3.bf16.msk.msra.mxu0 %vm384_vm2, %v490_v11 }
  0x37   :  { %399 = vmatpush3.bf16.msk.msra.mxu1 %vm396_vm15, %v490_v11 }
  0x38   :  { %401 = vmatprep.subr.msk.bf16.mxu1 %vm400_vm1, %v490_v11  ;;  %359 = vmatmul.mubr.msk.f32.vlgmr.msra.gmra.mrb[0].mxu0 %vm570_vm4, %v102_v14 }
  0x3b   :  { %403 = vmatpush3.bf16.msk.msra.mxu1 %vm400_vm1, %v490_v11 }
  0x3e   :  { %378 = vmatmul.mubr.msk.f32.vlgmr.msra.gmra.mrb[0].mxu1 %vm571_vm5, %v186_v15 }
 0x10b   :  { %v360_v16 = vpop.f32.mrb[0].mxu0 }
 0x10c   :  { %v176_v17 = vpop.f32.mrb[1].mxu0 }
 0x111   :  { %v379_v18 = vpop.f32.mrb[0].mxu1 }
 0x112   :  { %v270_v19 = vmul.f32 %v379_v18, %v360_v16  ;;  %v260_v20 = vpop.f32.mrb[1].mxu1 }
 0x113   :  { %v269_v21 = vmul.f32 %v260_v20, %v176_v17 }
 0x114   :  { %v272_v22 = vsel %vm271_vm6, %v270_v19, 0.0 }
 0x115   :  { %v273_v23 = vadd.f32 %v272_v22, %v269_v21 }
 0x117   :  { %v274_v24 = vrot.slane %v273_v23, 4 }
 0x119   :  { %v275_v25 = vadd.f32 %v274_v24, %v273_v23 }
 0x11b   :  { %v276_v26 = vrot.slane %v275_v25, 2 }
 0x11d   :  { %v277_v27 = vadd.f32 %v276_v26, %v275_v25 }
 0x11f   :  { %v278_v28 = vrot.slane %v277_v27, 1 }
 0x121   :  { %v279_v29 = vadd.f32 %v278_v28, %v277_v27 }
 0x123   :  { %v333_v30 = vmul.f32 -1.442695, %v279_v29 }
 0x125   :  { %410 = vpow2.f32 %v333_v30 }
 0x12f   :  { %v411_v31 = vpop.eup %410 }
 0x130   :  { %v283_v32 = vadd.f32 1.0, %v411_v31 }
 0x132   :  { %412 = vrcp.f32 %v283_v32 }
 0x13c   :  { %v413_v33 = vpop.eup %412 }
 0x13d   :  { %286 = vst [vmem:[#allocation7] sm:$0x1] %v413_v33 }
 0x13e   :  { %469 = shalt.err (!%p466_p6)
}
 0x13f   :  { %s470_s21 = scalar_lea.hbm %s567_s4, 16 }
 0x140   :  { %p471_p7 = scmp.ne.s32.totalorder %s567_s4, %s470_s21  ;;  %p474_p8 = scmp.lt.u32.totalorder %s470_s21, %s567_s4 }
 0x142   :  { %p476_p9 = pnand %p474_p8, %p471_p7 }
 0x144   :  { %479 = shalt.err (!%p476_p9)
}
 0x145   :  { %296 = dma.vmem_to_hbm [thread:$0]  %s294_s2, 16, %s567_s4, [#allocation4]  }
 0x146   :  { %484 = dma.done.wait [#allocation4], 16  }
 0x147   :  { %485 = vsyncadd [#allocation4], 4294967280 }
 0x148   :  { %300 = vsyncpa [#allocation3], 1 }
 0x149   :  { %301 = vsyncpa [#allocation6], 1 }
 0x14a   :  { %302 = vsyncpa [#allocation4], 1 }

</bundles_post_ra>
